<compile_context>
chip_gen: v7x
topology: tpu7x:2x2x1
jax: 0.10.0
libtpu: 0.0.40
codegen_flags: <defaults>
</compile_context>

<pallas_src>
import functools

import jax
import jax.numpy as jnp
from jax import lax
from jax.experimental import pallas as pl
from jax.experimental.pallas import tpu as pltpu


def _round_up(v: int, m: int) -> int:
    return ((v + m - 1) // m) * m


def _fc_kernel(x_ref, w_ref, b_ref, o_ref, acc_ref, *, use_relu: bool):
    # x_ref:   (tm, tk)  activation tile
    # w_ref:   (tn, tk)  weight tile in native (out, in) layout
    # b_ref:   (1,  tn)  bias tile
    # o_ref:   (tm, tn)  output tile
    # acc_ref: (tm, tn)  f32 accumulator, resident across the K axis
    k = pl.program_id(2)

    @pl.when(k == 0)
    def _():
        acc_ref[...] = jnp.zeros_like(acc_ref)

    # Contract last dim of x with last dim of w: (tm, tk) x (tn, tk) -> (tm, tn).
    acc_ref[...] += lax.dot_general(
        x_ref[...], w_ref[...],
        dimension_numbers=(((1,), (1,)), ((), ())),
        preferred_element_type=jnp.float32)

    @pl.when(k == pl.num_programs(2) - 1)
    def _():
        out = acc_ref[...] + b_ref[...].astype(jnp.float32)
        if use_relu:
            out = jnp.maximum(out, 0.0)
        o_ref[...] = out.astype(o_ref.dtype)


def fc_forward(x, weight, bias, *, use_relu=True, dropout_r=0.0,
               tm_max=256, tn_max=512, tk_max=512):
    """Pallas equivalent of FC.forward (Linear -> optional ReLU).

    x:      (..., in_size)
    weight: (out_size, in_size)   -- torch.nn.Linear convention
    bias:   (out_size,)
    """
    if dropout_r > 0.0:
        # TODO(synk): in-kernel dropout via pltpu.prng_seed/prng_random_bits
        # not implemented; default module config uses dropout_r=0.0.
        raise NotImplementedError("dropout_r > 0 not supported in this kernel")

    in_size = x.shape[-1]
    out_size = weight.shape[0]
    lead = x.shape[:-1]
    m = 1
    for d in lead:
        m *= d

    # Lane/sublane-aligned tile sizes (tn/tk multiples of 128, tm multiple of 8),
    # capped so tiles stay comfortably inside every generation's VMEM budget.
    tm = min(tm_max, _round_up(m, 8))
    tn = min(tn_max, _round_up(out_size, 128))
    tk = min(tk_max, _round_up(in_size, 128))

    # Pad to tile multiples (zero padding keeps the K reduction exact; padded
    # N/M rows are sliced off below).
    mp = _round_up(m, tm)
    kp = _round_up(in_size, tk)
    np_ = _round_up(out_size, tn)

    x2d = x.reshape(m, in_size)
    if mp != m or kp != in_size:
        x2d = jnp.pad(x2d, ((0, mp - m), (0, kp - in_size)))
    w_p = weight
    if np_ != out_size or kp != in_size:
        w_p = jnp.pad(weight, ((0, np_ - out_size), (0, kp - in_size)))
    b2d = bias.reshape(1, out_size)
    if np_ != out_size:
        b2d = jnp.pad(b2d, ((0, 0), (0, np_ - out_size)))

    grid = (pl.cdiv(mp, tm), pl.cdiv(np_, tn), pl.cdiv(kp, tk))

    kernel = functools.partial(_fc_kernel, use_relu=use_relu)

    bytes_accessed = (x2d.size * x2d.dtype.itemsize
                      + w_p.size * w_p.dtype.itemsize
                      + b2d.size * b2d.dtype.itemsize
                      + mp * np_ * x.dtype.itemsize)

    out2d = pl.pallas_call(
        kernel,
        out_shape=jax.ShapeDtypeStruct((mp, np_), x.dtype),
        grid_spec=pltpu.PrefetchScalarGridSpec(
            num_scalar_prefetch=0,
            grid=grid,
            in_specs=[
                pl.BlockSpec((tm, tk), lambda i, j, k: (i, k)),   # x
                pl.BlockSpec((tn, tk), lambda i, j, k: (j, k)),   # weight (out,in)
                pl.BlockSpec((1, tn), lambda i, j, k: (0, j)),    # bias
            ],
            out_specs=pl.BlockSpec((tm, tn), lambda i, j, k: (i, j)),
            scratch_shapes=[pltpu.VMEM((tm, tn), jnp.float32)],
        ),
        compiler_params=pltpu.CompilerParams(
            dimension_semantics=("parallel", "parallel", "arbitrary")),
        cost_estimate=pl.CostEstimate(
            flops=2 * mp * kp * np_,
            transcendentals=0,
            bytes_accessed=bytes_accessed),
    )(x2d, w_p, b2d)

    out2d = out2d[:m, :out_size]
    return out2d.reshape(*lead, out_size)


if __name__ == "__main__":
    key = jax.random.PRNGKey(0)
    kx, kw, kb = jax.random.split(key, 3)

    batch, seq, in_size, out_size = 2, 8, 32, 64
    x = jax.random.normal(kx, (batch, seq, in_size), dtype=jnp.float32)

    # Deterministic Linear params (torch convention: weight is (out, in)).
    bound = 1.0 / (in_size ** 0.5)
    weight = jax.random.uniform(kw, (out_size, in_size), jnp.float32,
                                minval=-bound, maxval=bound)
    bias = jax.random.uniform(kb, (out_size,), jnp.float32,
                              minval=-bound, maxval=bound)

    out = fc_forward(x, weight, bias, use_relu=True, dropout_r=0.0)
    out = jax.block_until_ready(out)

    # Reference check against plain JAX.
    ref = jnp.maximum(jnp.einsum("bsi,oi->bso", x, weight) + bias, 0.0)
    assert out.shape == (batch, seq, out_size)
    assert jnp.allclose(out, ref, atol=1e-5, rtol=1e-5)

    # A second, tile-exercising shape (forces multi-step M/N/K grid + padding).
    batch2, seq2, in2, out2 = 4, 96, 384, 640
    x2 = jax.random.normal(kx, (batch2, seq2, in2), dtype=jnp.float32)
    w2 = jax.random.uniform(kw, (out2, in2), jnp.float32,
                            minval=-0.05, maxval=0.05)
    b2 = jax.random.uniform(kb, (out2,), jnp.float32, minval=-0.05, maxval=0.05)
    o2 = jax.block_until_ready(
        fc_forward(x2, w2, b2, use_relu=True, tm_max=128, tn_max=256, tk_max=128))
    ref2 = jnp.maximum(jnp.einsum("bsi,oi->bso", x2, w2) + b2, 0.0)
    assert jnp.allclose(o2, ref2, atol=1e-4, rtol=1e-4)

    print("KERNEL_OK")
</pallas_src>

<mosaic_0001>
module attributes {stable_mosaic.version = 11 : i64} {
  func.func @_fc_kernel(%arg0: i32, %arg1: i32, %arg2: i32, %arg3: memref<16x128xf32, #tpu.memory_space<vmem>>, %arg4: memref<128x128xf32, #tpu.memory_space<vmem>>, %arg5: memref<1x128xf32, #tpu.memory_space<vmem>>, %arg6: memref<16x128xf32, #tpu.memory_space<vmem>>, %arg7: memref<16x128xf32, #tpu.memory_space<vmem>>) attributes {dimension_semantics = [#tpu.dimension_semantics<parallel>, #tpu.dimension_semantics<parallel>, #tpu.dimension_semantics<arbitrary>], iteration_bounds = array<i64: 1, 1, 1>, scalar_prefetch = 0 : i64, scratch_operands = 1 : i64, tpu.core_type = #tpu.core_type<tc>, window_params = [{transform_indices = @transform_0, window_bounds = array<i64: 16, 128>}, {transform_indices = @transform_1, window_bounds = array<i64: 128, 128>}, {transform_indices = @transform_2, window_bounds = array<i64: 1, 128>}, {transform_indices = @transform_3, window_bounds = array<i64: 16, 128>}]} {
    %c0_i32 = arith.constant 0 : i32
    %0 = arith.cmpi eq, %arg2, %c0_i32 : i32
    %1 = arith.extui %0 : i1 to i32
    %c0_i32_0 = arith.constant 0 : i32
    %2 = arith.cmpi ne, %1, %c0_i32_0 : i32
    scf.if %2 {
      %cst_10 = arith.constant 0.000000e+00 : f32
      %12 = vector.broadcast %cst_10 : f32 to vector<16x128xf32>
      %c0_11 = arith.constant 0 : index
      %c0_12 = arith.constant 0 : index
      %13 = vector.load %arg7[%c0_11, %c0_12] : memref<16x128xf32, #tpu.memory_space<vmem>>, vector<16x128xf32>
      tpu.vector_store %arg7[%c0_11, %c0_12], %12 {strides = array<i32>} : memref<16x128xf32, #tpu.memory_space<vmem>>, vector<16x128xf32>,
    } else {
    }
    %c0 = arith.constant 0 : index
    %c0_1 = arith.constant 0 : index
    %3 = vector.load %arg7[%c0, %c0_1] : memref<16x128xf32, #tpu.memory_space<vmem>>, vector<16x128xf32>
    %c0_2 = arith.constant 0 : index
    %c0_3 = arith.constant 0 : index
    %4 = vector.load %arg3[%c0_2, %c0_3] : memref<16x128xf32, #tpu.memory_space<vmem>>, vector<16x128xf32>
    %c0_4 = arith.constant 0 : index
    %c0_5 = arith.constant 0 : index
    %5 = vector.load %arg4[%c0_4, %c0_5] : memref<128x128xf32, #tpu.memory_space<vmem>>, vector<128x128xf32>
    %cst = arith.constant dense<0.000000e+00> : vector<16x128xf32>
    %6 = tpu.matmul %4, %5, %cst {dimension_numbers = #tpu.dot_dimension_numbers<[1], [1], [0], [0], [0, 0, 1, 0], [], []>} : vector<16x128xf32>, vector<128x128xf32>, vector<16x128xf32> -> vector<16x128xf32>
    %7 = arith.addf %3, %6 : vector<16x128xf32>
    %c0_6 = arith.constant 0 : index
    %c0_7 = arith.constant 0 : index
    %8 = vector.load %arg7[%c0_6, %c0_7] : memref<16x128xf32, #tpu.memory_space<vmem>>, vector<16x128xf32>
    tpu.vector_store %arg7[%c0_6, %c0_7], %7 {strides = array<i32>} : memref<16x128xf32, #tpu.memory_space<vmem>>, vector<16x128xf32>,
    %c0_i32_8 = arith.constant 0 : i32
    %9 = arith.cmpi eq, %arg2, %c0_i32_8 : i32
    %10 = arith.extui %9 : i1 to i32
    %c0_i32_9 = arith.constant 0 : i32
    %11 = arith.cmpi ne, %10, %c0_i32_9 : i32
    scf.if %11 {
      %c0_10 = arith.constant 0 : index
      %c0_11 = arith.constant 0 : index
      %12 = vector.load %arg7[%c0_10, %c0_11] : memref<16x128xf32, #tpu.memory_space<vmem>>, vector<16x128xf32>
      %c0_12 = arith.constant 0 : index
      %c0_13 = arith.constant 0 : index
      %13 = vector.load %arg5[%c0_12, %c0_13] : memref<1x128xf32, #tpu.memory_space<vmem>>, vector<1x128xf32>
      %14 = vector.broadcast %13 : vector<1x128xf32> to vector<16x128xf32>
      %15 = arith.addf %12, %14 : vector<16x128xf32>
      %cst_14 = arith.constant 0.000000e+00 : f32
      %16 = vector.broadcast %cst_14 : f32 to vector<16x128xf32>
      %17 = arith.maximumf %15, %16 : vector<16x128xf32>
      %c0_15 = arith.constant 0 : index
      %c0_16 = arith.constant 0 : index
      %18 = vector.load %arg6[%c0_15, %c0_16] : memref<16x128xf32, #tpu.memory_space<vmem>>, vector<16x128xf32>
      tpu.vector_store %arg6[%c0_15, %c0_16], %17 {strides = array<i32>} : memref<16x128xf32, #tpu.memory_space<vmem>>, vector<16x128xf32>,
    } else {
    }
    return
  }
  func.func @transform_0(%arg0: i32, %arg1: i32, %arg2: i32) -> (i32, i32) {
    %c0_i32 = arith.constant 0 : i32
    return %arg0, %arg2 : i32, i32
  }
  func.func @transform_1(%arg0: i32, %arg1: i32, %arg2: i32) -> (i32, i32) {
    %c0_i32 = arith.constant 0 : i32
    return %arg1, %arg2 : i32, i32
  }
  func.func @transform_2(%arg0: i32, %arg1: i32, %arg2: i32) -> (i32, i32) {
    %c0_i32 = arith.constant 0 : i32
    %c0_i32_0 = arith.constant 0 : i32
    return %c0_i32, %arg1 : i32, i32
  }
  func.func @transform_3(%arg0: i32, %arg1: i32, %arg2: i32) -> (i32, i32) {
    %c0_i32 = arith.constant 0 : i32
    return %arg0, %arg1 : i32, i32
  }
}

</mosaic_0001>

<bundles_post_ra>
// kernel: tpu_custom_call.1
= control target key start
LH: loop header
LB: loop body
LE: loop exit
PB: predicated region body
PF: predicated region fallthrough
CT: control target
= control target key end

     0   :  { %8 = vsyncpa [#allocation4], 0  ;;  %s420_s0 = inlined_call_operand.hbm [shape: f32[16,128], index: 0, kind: input, shape index: {}]   ;;  %s421_s1 = inlined_call_operand.hbm [shape: f32[128,128], index: 1, kind: input, shape index: {}]   ;;  %s422_s2 = inlined_call_operand.vmem [shape: f32[1,128], index: 2, kind: input, shape index: {}]   ;;  %s423_s3 = inlined_call_operand.hbm [shape: f32[16,128], index: 3, kind: output, shape index: {}]  }
   0x1   :  { %9 = vsyncpa [#allocation7], 0 }
   0x2   :  { %10 = vsyncpa [#allocation5], 0  ;;  %s347_s12 = smov [#allocation3]   ;;  %s275_s16 = scalar_lea.hbm %s420_s0, 256 }
   0x3   :  { %s16_s13 = sshll.u32 %s347_s12, 4  ;;  %p276_p0 = scmp.ne.s32.totalorder %s420_s0, %s275_s16  ;;  %s17_s13 = int_to_ptr.vmem [resolvable:$true] %s16_s13 }
   0x4   :  { %p279_p1 = scmp.lt.u32.totalorder %s275_s16, %s420_s0 }
   0x6   :  { %p281_p2 = pnand %p279_p1, %p276_p0 }
   0x8   :  { %284 = shalt.err (!%p281_p2)
}
   0x9   :  { %s285_s21 = scalar_lea.vmem %s17_s13, 256  ;;  %p290_p4 = scmp.lt.s32.totalorder %s17_s13, %s17_s13 }
   0xa   :  { %p286_p3 = scmp.ne.s32.totalorder %s17_s13, %s285_s21  ;;  %p291_p5 = scmp.lt.s32.totalorder %s285_s21, %s285_s21 }
   0xc   :  { %p292_p6 = por %p291_p5, %p290_p4 }
   0xe   :  { %p293_p7 = pnand %p292_p6, %p286_p3 }
  0x10   :  { %296 = shalt.err (!%p293_p7)
}
  0x11   :  { %s348_s22 = smov 128   ;;  %s349_s23 = smov 8  }
  0x12   :  { %22 = dma.hbm_to_vmem [thread:$0]  %s420_s0, 256, %s17_s13, [#allocation4], %s348_s22, %s348_s22, %s349_s23  }
  0x13   :  { %s350_s26 = smov [#allocation6]   ;;  %s297_s30 = scalar_lea.hbm %s421_s1, 2048 }
  0x14   :  { %s28_s27 = sshll.u32 %s350_s26, 4  ;;  %p298_p8 = scmp.ne.s32.totalorder %s421_s1, %s297_s30  ;;  %s29_s27 = int_to_ptr.vmem [resolvable:$true] %s28_s27 }
  0x15   :  { %p301_p9 = scmp.lt.u32.totalorder %s297_s30, %s421_s1 }
  0x17   :  { %p303_p10 = pnand %p301_p9, %p298_p8 }
  0x19   :  { %306 = shalt.err (!%p303_p10)
}
  0x1a   :  { %s307_s8 = scalar_lea.vmem %s29_s27, 2048  ;;  %p312_p12 = scmp.lt.s32.totalorder %s29_s27, %s29_s27 }
  0x1b   :  { %p308_p11 = scmp.ne.s32.totalorder %s29_s27, %s307_s8  ;;  %p313_p13 = scmp.lt.s32.totalorder %s307_s8, %s307_s8 }
  0x1d   :  { %p314_p0 = por %p313_p13, %p312_p12 }
  0x1f   :  { %p315_p1 = pnand %p314_p0, %p308_p11 }
  0x21   :  { %318 = shalt.err (!%p315_p1)
}
  0x22   :  { %34 = dma.hbm_to_vmem [thread:$0]  %s421_s1, 2048, %s29_s27, [#allocation7], %s348_s22, %s348_s22, %s349_s23  }
  0x23   :  { %341 = dma.done.wait [#allocation4], 256  }
  0x24   :  { %342 = vsyncadd [#allocation4], 4294967040 }
  0x25   :  { %343 = dma.done.wait [#allocation7], 2048  }
  0x26   :  { %344 = vsyncadd [#allocation7], 4294965248  ;;  %v53_v0 = vld [vmem:[#allocation6] sm:$0xff]  ;;  %v54_v1 = vld [vmem:[#allocation6 + $0x8] sm:$0xff]  ;;  %s351_s11 = smov [#allocation8]  }
  0x27   :  { %v55_v2 = vld [vmem:[#allocation6 + $0x10] sm:$0xff]  ;;  %v238_v3 = vpack.c.bf16 %v54_v1, %v53_v0  ;;  %v56_v4 = vld [vmem:[#allocation6 + $0x18] sm:$0xff]  ;;  %v57_v7 = vld [vmem:[#allocation6 + $0x20] sm:$0xff]  ;;  %s171_s12 = sshll.u32 %s351_s11, 4  ;;  %s172_s12 = int_to_ptr.vmem [resolvable:$true] %s171_s12 }
  0x28   :  { %v242_v5 = vpack.c.bf16 %v56_v4, %v55_v2  ;;  %v51_v6 = vld [vmem:[#allocation3] sm:$0xff]  ;;  %v58_v8 = vld [vmem:[#allocation6 + $0x28] sm:$0xff]  ;;  %v60_v11 = vld [vmem:[#allocation6 + $0x38] sm:$0xff]  ;;  %s319_s13 = scalar_lea.vmem %s172_s12, 256  ;;  %p324_p3 = scmp.lt.s32.totalorder %s172_s12, %s172_s12 }
  0x29   :  { %239 = vmatprep.subr.bf16.mxu0 %v238_v3  ;;  %235 = vmatprep.mubr.f32.mxu0 %v51_v6  ;;  %v246_v9 = vpack.c.bf16 %v58_v8, %v57_v7  ;;  %v59_v10 = vld [vmem:[#allocation6 + $0x30] sm:$0xff]  ;;  %v61_v13 = vld [vmem:[#allocation6 + $0x40] sm:$0xff]  ;;  %v62_v14 = vld [vmem:[#allocation6 + $0x48] sm:$0xff]  ;;  %p320_p2 = scmp.ne.s32.totalorder %s172_s12, %s319_s13  ;;  %p325_p4 = scmp.lt.s32.totalorder %s319_s13, %s319_s13 }
  0x2a   :  { %241 = vmatpush3.bf16.xpose.msra.mxu0 %v238_v3  ;;  %v250_v12 = vpack.c.bf16 %v60_v11, %v59_v10  ;;  %v254_v15 = vpack.c.bf16 %v62_v14, %v61_v13  ;;  %v63_v16 = vld [vmem:[#allocation6 + $0x50] sm:$0xff]  ;;  %v64_v17 = vld [vmem:[#allocation6 + $0x58] sm:$0xff]  ;;  %v65_v19 = vld [vmem:[#allocation6 + $0x60] sm:$0xff] }
  0x2b   :  { %243 = vmatprep.subr.bf16.mxu0 %v242_v5  ;;  %v258_v18 = vpack.c.bf16 %v64_v17, %v63_v16  ;;  %v66_v20 = vld [vmem:[#allocation6 + $0x68] sm:$0xff]  ;;  %v67_v22 = vld [vmem:[#allocation6 + $0x70] sm:$0xff]  ;;  %v68_v23 = vld [vmem:[#allocation6 + $0x78] sm:$0xff]  ;;  %p326_p5 = por %p325_p4, %p324_p3 }
  0x2c   :  { %v262_v21 = vpack.c.bf16 %v66_v20, %v65_v19  ;;  %v266_v24 = vpack.c.bf16 %v68_v23, %v67_v22  ;;  %v52_v25 = vld [vmem:[#allocation3 + $0x8] sm:$0xff]  ;;  %v184_v26 = vld [vmem:[%s422_s2] ss:$0 sm:$0xff] }
  0x2d   :  { %p327_p6 = pnand %p326_p5, %p320_p2 }
  0x32   :  { %245 = vmatpush3.bf16.xpose.msra.mxu0 %v242_v5 }
  0x33   :  { %247 = vmatprep.subr.bf16.mxu0 %v246_v9 }
  0x3a   :  { %249 = vmatpush3.bf16.xpose.msra.mxu0 %v246_v9 }
  0x3b   :  { %251 = vmatprep.subr.bf16.mxu0 %v250_v12 }
  0x42   :  { %253 = vmatpush3.bf16.xpose.msra.mxu0 %v250_v12 }
  0x43   :  { %255 = vmatprep.subr.bf16.mxu0 %v254_v15 }
  0x4a   :  { %257 = vmatpush3.bf16.xpose.msra.mxu0 %v254_v15 }
  0x4b   :  { %259 = vmatprep.subr.bf16.mxu0 %v258_v18 }
  0x52   :  { %261 = vmatpush3.bf16.xpose.msra.mxu0 %v258_v18 }
  0x53   :  { %263 = vmatprep.subr.bf16.mxu0 %v262_v21 }
  0x5a   :  { %265 = vmatpush3.bf16.xpose.msra.mxu0 %v262_v21 }
  0x5b   :  { %267 = vmatprep.subr.bf16.mxu0 %v266_v24 }
  0x62   :  { %269 = vmatpush3.bf16.xpose.msra.mxu0 %v266_v24 }
  0x69   :  { %236 = vmatmul.mubr.f32.vlgmr.msra.gmra.mrb[0].mxu0 %v52_v25 }
 0x13c   :  { %v237_v27 = vpop.f32.mrb[0].mxu0 }
 0x13d   :  { %v161_v28 = vadd.f32 %v237_v27, %v184_v26  ;;  %v135_v29 = vpop.f32.mrb[1].mxu0 }
 0x13e   :  { %v160_v30 = vadd.f32 %v184_v26, %v135_v29 }
 0x13f   :  { %v163_v31 = vmax.f32 %v161_v28, 0.0 }
 0x140   :  { %v162_v32 = vmax.f32 %v160_v30, 0.0 }
 0x141   :  { %165 = vst [vmem:[#allocation8 + $0x8] sm:$0xff] %v163_v31 }
 0x142   :  { %164 = vst [vmem:[#allocation8] sm:$0xff] %v162_v32 }
 0x143   :  { %330 = shalt.err (!%p327_p6)
}
 0x144   :  { %s331_s15 = scalar_lea.hbm %s423_s3, 256 }
 0x145   :  { %p332_p7 = scmp.ne.s32.totalorder %s423_s3, %s331_s15  ;;  %p335_p8 = scmp.lt.u32.totalorder %s331_s15, %s423_s3 }
 0x147   :  { %p337_p9 = pnand %p335_p8, %p332_p7 }
 0x149   :  { %340 = shalt.err (!%p337_p9)
}
 0x14a   :  { %177 = dma.vmem_to_hbm [thread:$0]  %s172_s12, 256, %s423_s3, [#allocation5], %s348_s22, %s348_s22, %s349_s23  }
 0x14b   :  { %345 = dma.done.wait [#allocation5], 256  }
 0x14c   :  { %346 = vsyncadd [#allocation5], 4294967040 }
 0x14d   :  { %181 = vsyncpa [#allocation4], 1 }
 0x14e   :  { %182 = vsyncpa [#allocation7], 1 }
 0x14f   :  { %183 = vsyncpa [#allocation5], 1 }

</bundles_post_ra>
